<compile_context>
chip_gen: v5e
topology: v5e:2x2
jax: 0.10.0
libtpu: 0.0.40
codegen_flags: <defaults>
</compile_context>

<pallas_src>
import jax
import jax.numpy as jnp
from jax import lax
from jax.experimental import pallas as pl
from jax.experimental.pallas import tpu as pltpu


def make_attention_kernel(dim, num_heads, tile_n):
    head_dim = dim // num_heads

    def kernel(x_ref, wq_ref, wk_ref, wv_ref, wproj_ref, bproj_ref,
               o_ref, k_s, v_s, y_acc):
        qi = pl.program_id(1)

        # ---- K / V projection: once per batch row (qi == 0), head-major.
        # K stored pre-transposed as (hd, N) so later score matmuls are plain
        # (m, k) @ (k, n).  The per-head loop keeps the f32 transient bounded
        # to (hd, N) / (N, hd) instead of a full (N, 2D) temporary.
        @pl.when(qi == 0)
        def _():
            @pl.loop(0, num_heads)
            def _(h):
                x_kv = x_ref[0]                                    # (N, D) bf16
                # (x @ Wk_h)^T computed directly: contract feature dim of both.
                k_s[h] = lax.dot_general(
                    wk_ref[h], x_kv, (((1,), (1,)), ((), ())),
                    preferred_element_type=jnp.float32).astype(jnp.bfloat16)
                v_s[h] = jnp.dot(
                    x_kv, wv_ref[h],
                    preferred_element_type=jnp.float32).astype(jnp.bfloat16)

        # ---- Query tile sliced from the resident x block (x is passed once).
        start = pl.multiple_of(qi * tile_n, tile_n)
        x_q = x_ref[0, pl.ds(start, tile_n), :]                    # (Tn, D) bf16

        y_acc[...] = jnp.zeros_like(y_acc)

        # ---- Per-head attention + output-projection accumulation.
        # Rolled loop: no unrolled live-range blowup, head-major indexing
        # avoids masked partial loads/stores when head_dim < 128.
        @pl.loop(0, num_heads)
        def _(h):
            # `scale` is folded into Wq in the wrapper.
            q_h = jnp.dot(x_q, wq_ref[h],
                          preferred_element_type=jnp.float32
                          ).astype(jnp.bfloat16)                   # (Tn, hd)
            dots = jnp.dot(q_h, k_s[h],
                           preferred_element_type=jnp.float32)     # (Tn, N)
            dots = dots - jnp.max(dots, axis=-1, keepdims=True)
            e = jnp.exp(dots)                                      # f32 (v5e-safe)
            denom = jnp.sum(e, axis=-1, keepdims=True)
            attn = (e * pl.reciprocal(denom, approx=True)).astype(jnp.bfloat16)
            out_h = jnp.dot(attn, v_s[h],
                            preferred_element_type=jnp.float32
                            ).astype(jnp.bfloat16)                 # (Tn, hd)
            # Head contribution to the output projection.
            y_acc[...] += jnp.dot(out_h, wproj_ref[h],
                                  preferred_element_type=jnp.float32)

        # ---- Bias add + writeback in input dtype.
        o_ref[0] = (y_acc[...] + bproj_ref[...]).astype(o_ref.dtype)

    return kernel


def attention_forward(x, params, *, num_heads, tile_n=None):
    B, N, D = x.shape
    H = num_heads
    hd = D // H
    scale = hd ** (-0.5)

    if tile_n is None:
        tile_n = N if N <= 256 else 256
    assert N % tile_n == 0, "sequence length must be divisible by the q tile"
    T = N // tile_n

    # ---- Wrapper-side weight prep: head-major, bf16, scale folded into Wq.
    # Wqkv columns are laid out [qkv, h, d] (matches
    # rearrange 'b n (qkv h d) -> qkv b h n d').
    wqkv = params["wqkv"]
    wq = (wqkv[:, :D] * scale).reshape(D, H, hd)
    wk = wqkv[:, D:2 * D].reshape(D, H, hd)
    wv = wqkv[:, 2 * D:].reshape(D, H, hd)
    wq_hm = jnp.transpose(wq, (1, 0, 2)).astype(jnp.bfloat16)        # (H, D, hd)
    wk_hm = jnp.transpose(wk, (1, 2, 0)).astype(jnp.bfloat16)        # (H, hd, D)
    wv_hm = jnp.transpose(wv, (1, 0, 2)).astype(jnp.bfloat16)        # (H, D, hd)
    wproj_hm = params["wproj"].reshape(H, hd, D).astype(jnp.bfloat16)  # (H, hd, D)
    bproj = params["bproj"].astype(jnp.float32).reshape(1, D)

    x_bf16 = x.astype(jnp.bfloat16)   # halve activation HBM traffic / VMEM

    kernel = make_attention_kernel(D, H, tile_n)

    def weight_spec(shape):
        # Full-array weight block, constant index map, single-buffered: the
        # block never changes across the grid so double-buffering only wastes
        # VMEM (matters on v7x's 64 MiB / v5e's small scoped default).
        rank = len(shape)
        return pl.BlockSpec(shape, lambda b, qi, _r=rank: (0,) * _r,
                            pipeline_mode=pl.Buffered(1))

    # ---- VMEM budget computed from the actual resident buffers (+50% slack).
    out_itemsize = jnp.dtype(x.dtype).itemsize
    est_vmem = (
        8 * D * D + 4 * D                       # bf16 weights + f32 bias
        + 2 * (N * D * 2)                       # x block (bf16, double-buffered)
        + 2 * (tile_n * D * out_itemsize)       # out block (double-buffered)
        + N * D * 2                             # K scratch (H, hd, N) bf16
        + H * N * max(hd, 128) * 2              # V scratch (H, N, hd), lane-padded
        + tile_n * D * 4                        # projection accumulator (f32)
        + 6 * tile_n * N * 4                    # score/softmax transients (f32)
    )
    vmem_limit = int(min(max(est_vmem * 3 // 2, 32 * 1024 * 1024),
                         100 * 1024 * 1024))

    flops = 2 * B * N * D * (4 * D + 2 * N)
    transcendentals = B * H * N * (N + 1)
    bytes_accessed = (2 * B * N * D * 2) + (B * N * D * out_itemsize) \
        + (8 * D * D) + (4 * D)

    return pl.pallas_call(
        kernel,
        out_shape=jax.ShapeDtypeStruct((B, N, D), x.dtype),
        grid_spec=pltpu.PrefetchScalarGridSpec(
            num_scalar_prefetch=0,
            grid=(B, T),
            in_specs=[
                # x passed once per batch row, bf16, resident across q tiles.
                pl.BlockSpec((1, N, D), lambda b, qi: (b, 0, 0)),
                weight_spec((H, D, hd)),      # Wq (scale folded in)
                weight_spec((H, hd, D)),      # Wk (pre-transposed per head)
                weight_spec((H, D, hd)),      # Wv
                weight_spec((H, hd, D)),      # Wproj (head-major rows)
                weight_spec((1, D)),          # bproj
            ],
            out_specs=pl.BlockSpec((1, tile_n, D), lambda b, qi: (b, qi, 0)),
            scratch_shapes=[
                pltpu.VMEM((H, hd, N), jnp.bfloat16),   # K cache (per batch row)
                pltpu.VMEM((H, N, hd), jnp.bfloat16),   # V cache (per batch row)
                pltpu.VMEM((tile_n, D), jnp.float32),   # projection accumulator
            ],
        ),
        compiler_params=pltpu.CompilerParams(
            dimension_semantics=("parallel", "arbitrary"),
            vmem_limit_bytes=vmem_limit),
        cost_estimate=pl.CostEstimate(
            flops=flops,
            transcendentals=transcendentals,
            bytes_accessed=bytes_accessed),
    )(x_bf16, wq_hm, wk_hm, wv_hm, wproj_hm, bproj)


def init_params(key, dim):
    ks = jax.random.split(key, 3)
    s = 0.02
    return {
        # Linear weights stored as (in, out): kernel computes x @ W + b
        # (equivalent to PyTorch's x @ W_torch.T + b).
        # Wqkv columns laid out [q heads | k heads | v heads].
        "wqkv": s * jax.random.normal(ks[0], (dim, 3 * dim), jnp.float32),  # qkv_bias=False
        "wproj": s * jax.random.normal(ks[1], (dim, dim), jnp.float32),
        "bproj": s * jax.random.normal(ks[2], (1, dim), jnp.float32),       # isWithBias=True
    }


def attention_reference(x, params, *, num_heads):
    """Pure-JAX f32 reference matching the PyTorch module forward (eval mode)."""
    B, N, D = x.shape
    hd = D // num_heads
    scale = hd ** (-0.5)
    qkv = x @ params["wqkv"]                               # (B, N, 3D)
    qkv = qkv.reshape(B, N, 3, num_heads, hd)
    q = jnp.transpose(qkv[:, :, 0], (0, 2, 1, 3))          # (B, H, N, hd)
    k = jnp.transpose(qkv[:, :, 1], (0, 2, 1, 3))
    v = jnp.transpose(qkv[:, :, 2], (0, 2, 1, 3))
    dots = jnp.einsum("bhid,bhjd->bhij", q, k) * scale
    attn = jax.nn.softmax(dots, axis=-1)
    out = jnp.einsum("bhij,bhjd->bhid", attn, v)
    out = jnp.transpose(out, (0, 2, 1, 3)).reshape(B, N, D)
    return out @ params["wproj"] + params["bproj"][0]


if __name__ == "__main__":
    B, N, D = 2, 8, 32
    NUM_HEADS = 4

    key = jax.random.PRNGKey(0)
    kx, kp = jax.random.split(key)
    x = jax.random.normal(kx, (B, N, D), jnp.float32)
    params = init_params(kp, D)

    out = attention_forward(x, params, num_heads=NUM_HEADS)
    out = jax.block_until_ready(out)

    ref = attention_reference(x, params, num_heads=NUM_HEADS)
    assert out.shape == (B, N, D)
    max_err = float(jnp.max(jnp.abs(out - ref)))
    # Tolerance reflects bf16 matmul operands + approx-reciprocal softmax.
    assert jnp.allclose(out, ref, atol=2e-2, rtol=2e-2), \
        f"mismatch vs reference (max abs err {max_err})"

    print("KERNEL_OK")
</pallas_src>

<mosaic_0001>
module attributes {stable_mosaic.version = 11 : i64} {
  func.func @kernel(%arg0: i32, %arg1: i32, %arg2: memref<1x8x32xbf16, #tpu.memory_space<vmem>>, %arg3: memref<4x32x8xbf16, #tpu.memory_space<vmem>>, %arg4: memref<4x8x32xbf16, #tpu.memory_space<vmem>>, %arg5: memref<4x32x8xbf16, #tpu.memory_space<vmem>>, %arg6: memref<4x8x32xbf16, #tpu.memory_space<vmem>>, %arg7: memref<1x32xf32, #tpu.memory_space<vmem>>, %arg8: memref<1x8x32xf32, #tpu.memory_space<vmem>>, %arg9: memref<4x8x8xbf16, #tpu.memory_space<vmem>>, %arg10: memref<4x8x8xbf16, #tpu.memory_space<vmem>>, %arg11: memref<8x32xf32, #tpu.memory_space<vmem>>) attributes {dimension_semantics = [#tpu.dimension_semantics<parallel>, #tpu.dimension_semantics<arbitrary>], iteration_bounds = array<i64: 2, 1>, scalar_prefetch = 0 : i64, scratch_operands = 3 : i64, tpu.core_type = #tpu.core_type<tc>, window_params = [{transform_indices = @transform_0, window_bounds = array<i64: 1, 8, 32>}, {pipeline_mode = #tpu.pipeline_mode<synchronous>, transform_indices = @transform_1, window_bounds = array<i64: 4, 32, 8>}, {pipeline_mode = #tpu.pipeline_mode<synchronous>, transform_indices = @transform_2, window_bounds = array<i64: 4, 8, 32>}, {pipeline_mode = #tpu.pipeline_mode<synchronous>, transform_indices = @transform_3, window_bounds = array<i64: 4, 32, 8>}, {pipeline_mode = #tpu.pipeline_mode<synchronous>, transform_indices = @transform_4, window_bounds = array<i64: 4, 8, 32>}, {pipeline_mode = #tpu.pipeline_mode<synchronous>, transform_indices = @transform_5, window_bounds = array<i64: 1, 32>}, {transform_indices = @transform_6, window_bounds = array<i64: 1, 8, 32>}]} {
    %c0_i32 = arith.constant 0 : i32
    %0 = arith.cmpi eq, %arg1, %c0_i32 : i32
    %1 = arith.extui %0 : i1 to i32
    %c0_i32_0 = arith.constant 0 : i32
    %2 = arith.cmpi ne, %1, %c0_i32_0 : i32
    scf.if %2 {
      %c0_i32_13 = arith.constant 0 : i32
      %c4_i32_14 = arith.constant 4 : i32
      %18 = arith.addi %c0_i32_13, %c4_i32_14 : i32
      %c1_i32_15 = arith.constant 1 : i32
      scf.for %arg12 = %c0_i32_13 to %18 step %c1_i32_15  : i32 {
        %c1_i32_17 = arith.constant 1 : i32
        %19 = arith.muli %arg12, %c1_i32_17 : i32
        %c0_i32_18 = arith.constant 0 : i32
        %20 = arith.addi %c0_i32_18, %19 : i32
        %c0_19 = arith.constant 0 : index
        %c0_20 = arith.constant 0 : index
        %c0_21 = arith.constant 0 : index
        %21 = vector.load %arg2[%c0_19, %c0_20, %c0_21] : memref<1x8x32xbf16, #tpu.memory_space<vmem>>, vector<1x8x32xbf16>
        %22 = vector.shape_cast %21 : vector<1x8x32xbf16> to vector<8x32xbf16>
        %23 = arith.index_cast %20 : i32 to index
        %c0_22 = arith.constant 0 : index
        %c0_23 = arith.constant 0 : index
        %24 = vector.load %arg4[%23, %c0_22, %c0_23] : memref<4x8x32xbf16, #tpu.memory_space<vmem>>, vector<1x8x32xbf16>
        %25 = vector.shape_cast %24 : vector<1x8x32xbf16> to vector<8x32xbf16>
        %cst_24 = arith.constant dense<0.000000e+00> : vector<8x8xf32>
        %26 = tpu.matmul %25, %22, %cst_24 {dimension_numbers = #tpu.dot_dimension_numbers<[1], [1], [0], [0], [0, 0, 1, 0], [], []>} : vector<8x32xbf16>, vector<8x32xbf16>, vector<8x8xf32> -> vector<8x8xf32>
        %27 = arith.truncf %26 : vector<8x8xf32> to vector<8x8xbf16>
        %28 = arith.index_cast %20 : i32 to index
        %c0_25 = arith.constant 0 : index
        %c0_26 = arith.constant 0 : index
        %29 = vector.load %arg9[%28, %c0_25, %c0_26] : memref<4x8x8xbf16, #tpu.memory_space<vmem>>, vector<1x8x8xbf16>
        %30 = vector.shape_cast %29 : vector<1x8x8xbf16> to vector<8x8xbf16>
        %31 = vector.shape_cast %27 : vector<8x8xbf16> to vector<1x8x8xbf16>
        tpu.vector_store %arg9[%28, %c0_25, %c0_26], %31 {strides = array<i32>} : memref<4x8x8xbf16, #tpu.memory_space<vmem>>, vector<1x8x8xbf16>,
        %32 = arith.index_cast %20 : i32 to index
        %c0_27 = arith.constant 0 : index
        %c0_28 = arith.constant 0 : index
        %33 = vector.load %arg5[%32, %c0_27, %c0_28] : memref<4x32x8xbf16, #tpu.memory_space<vmem>>, vector<1x32x8xbf16>
        %34 = vector.shape_cast %33 : vector<1x32x8xbf16> to vector<32x8xbf16>
        %cst_29 = arith.constant dense<0.000000e+00> : vector<8x8xf32>
        %35 = tpu.matmul %22, %34, %cst_29 {dimension_numbers = #tpu.dot_dimension_numbers<[1], [0], [0], [1], [0, 0, 1, 1], [], []>} : vector<8x32xbf16>, vector<32x8xbf16>, vector<8x8xf32> -> vector<8x8xf32>
        %36 = arith.truncf %35 : vector<8x8xf32> to vector<8x8xbf16>
        %37 = arith.index_cast %20 : i32 to index
        %c0_30 = arith.constant 0 : index
        %c0_31 = arith.constant 0 : index
        %38 = vector.load %arg10[%37, %c0_30, %c0_31] : memref<4x8x8xbf16, #tpu.memory_space<vmem>>, vector<1x8x8xbf16>
        %39 = vector.shape_cast %38 : vector<1x8x8xbf16> to vector<8x8xbf16>
        %40 = vector.shape_cast %36 : vector<8x8xbf16> to vector<1x8x8xbf16>
        tpu.vector_store %arg10[%37, %c0_30, %c0_31], %40 {strides = array<i32>} : memref<4x8x8xbf16, #tpu.memory_space<vmem>>, vector<1x8x8xbf16>,
      }
      %c4_i32_16 = arith.constant 4 : i32
    } else {
    }
    %c8_i32 = arith.constant 8 : i32
    %3 = arith.muli %arg1, %c8_i32 : i32
    %4 = tpu.assume_multiple %3, 8 : i32
    %c0 = arith.constant 0 : index
    %5 = arith.index_cast %4 : i32 to index
    %c0_1 = arith.constant 0 : index
    %6 = vector.load %arg2[%c0, %5, %c0_1] : memref<1x8x32xbf16, #tpu.memory_space<vmem>>, vector<1x8x32xbf16>
    %7 = vector.shape_cast %6 : vector<1x8x32xbf16> to vector<8x32xbf16>
    %cst = arith.constant 0.000000e+00 : f32
    %8 = vector.broadcast %cst : f32 to vector<8x32xf32>
    %c0_2 = arith.constant 0 : index
    %c0_3 = arith.constant 0 : index
    %9 = vector.load %arg11[%c0_2, %c0_3] : memref<8x32xf32, #tpu.memory_space<vmem>>, vector<8x32xf32>
    tpu.vector_store %arg11[%c0_2, %c0_3], %8 {strides = array<i32>} : memref<8x32xf32, #tpu.memory_space<vmem>>, vector<8x32xf32>,
    %c0_i32_4 = arith.constant 0 : i32
    %c4_i32 = arith.constant 4 : i32
    %10 = arith.addi %c0_i32_4, %c4_i32 : i32
    %c1_i32 = arith.constant 1 : i32
    scf.for %arg12 = %c0_i32_4 to %10 step %c1_i32  : i32 {
      %c1_i32_13 = arith.constant 1 : i32
      %18 = arith.muli %arg12, %c1_i32_13 : i32
      %c0_i32_14 = arith.constant 0 : i32
      %19 = arith.addi %c0_i32_14, %18 : i32
      %20 = arith.index_cast %19 : i32 to index
      %c0_15 = arith.constant 0 : index
      %c0_16 = arith.constant 0 : index
      %21 = vector.load %arg3[%20, %c0_15, %c0_16] : memref<4x32x8xbf16, #tpu.memory_space<vmem>>, vector<1x32x8xbf16>
      %22 = vector.shape_cast %21 : vector<1x32x8xbf16> to vector<32x8xbf16>
      %cst_17 = arith.constant dense<0.000000e+00> : vector<8x8xf32>
      %23 = tpu.matmul %7, %22, %cst_17 {dimension_numbers = #tpu.dot_dimension_numbers<[1], [0], [0], [1], [0, 0, 1, 1], [], []>} : vector<8x32xbf16>, vector<32x8xbf16>, vector<8x8xf32> -> vector<8x8xf32>
      %24 = arith.truncf %23 : vector<8x8xf32> to vector<8x8xbf16>
      %25 = arith.index_cast %19 : i32 to index
      %c0_18 = arith.constant 0 : index
      %c0_19 = arith.constant 0 : index
      %26 = vector.load %arg9[%25, %c0_18, %c0_19] : memref<4x8x8xbf16, #tpu.memory_space<vmem>>, vector<1x8x8xbf16>
      %27 = vector.shape_cast %26 : vector<1x8x8xbf16> to vector<8x8xbf16>
      %cst_20 = arith.constant dense<0.000000e+00> : vector<8x8xf32>
      %28 = tpu.matmul %24, %27, %cst_20 {dimension_numbers = #tpu.dot_dimension_numbers<[1], [0], [0], [1], [0, 0, 1, 1], [], []>} : vector<8x8xbf16>, vector<8x8xbf16>, vector<8x8xf32> -> vector<8x8xf32>
      %cst_21 = arith.constant dense<0xFF800000> : vector<8xf32>
      %29 = vector.multi_reduction <maximumf>, %28, %cst_21 [1] : vector<8x8xf32> to vector<8xf32>
      %30 = vector.shape_cast %29 : vector<8xf32> to vector<8x1xf32>
      %31 = vector.broadcast %30 : vector<8x1xf32> to vector<8x8xf32>
      %32 = arith.subf %28, %31 : vector<8x8xf32>
      %33 = math.exp %32 : vector<8x8xf32>
      %cst_22 = arith.constant dense<0.000000e+00> : vector<8xf32>
      %34 = vector.multi_reduction <add>, %33, %cst_22 [1] : vector<8x8xf32> to vector<8xf32>
      %35 = vector.shape_cast %34 : vector<8xf32> to vector<8x1xf32>
      %36 = tpu.reciprocal %35 {approx = true} : vector<8x1xf32> -> vector<8x1xf32>
      %37 = vector.broadcast %36 : vector<8x1xf32> to vector<8x8xf32>
      %38 = arith.mulf %33, %37 : vector<8x8xf32>
      %39 = arith.truncf %38 : vector<8x8xf32> to vector<8x8xbf16>
      %40 = arith.index_cast %19 : i32 to index
      %c0_23 = arith.constant 0 : index
      %c0_24 = arith.constant 0 : index
      %41 = vector.load %arg10[%40, %c0_23, %c0_24] : memref<4x8x8xbf16, #tpu.memory_space<vmem>>, vector<1x8x8xbf16>
      %42 = vector.shape_cast %41 : vector<1x8x8xbf16> to vector<8x8xbf16>
      %cst_25 = arith.constant dense<0.000000e+00> : vector<8x8xf32>
      %43 = tpu.matmul %39, %42, %cst_25 {dimension_numbers = #tpu.dot_dimension_numbers<[1], [0], [0], [1], [0, 0, 1, 1], [], []>} : vector<8x8xbf16>, vector<8x8xbf16>, vector<8x8xf32> -> vector<8x8xf32>
      %44 = arith.truncf %43 : vector<8x8xf32> to vector<8x8xbf16>
      %c0_26 = arith.constant 0 : index
      %c0_27 = arith.constant 0 : index
      %45 = vector.load %arg11[%c0_26, %c0_27] : memref<8x32xf32, #tpu.memory_space<vmem>>, vector<8x32xf32>
      %46 = arith.index_cast %19 : i32 to index
      %c0_28 = arith.constant 0 : index
      %c0_29 = arith.constant 0 : index
      %47 = vector.load %arg6[%46, %c0_28, %c0_29] : memref<4x8x32xbf16, #tpu.memory_space<vmem>>, vector<1x8x32xbf16>
      %48 = vector.shape_cast %47 : vector<1x8x32xbf16> to vector<8x32xbf16>
      %cst_30 = arith.constant dense<0.000000e+00> : vector<8x32xf32>
      %49 = tpu.matmul %44, %48, %cst_30 {dimension_numbers = #tpu.dot_dimension_numbers<[1], [0], [0], [1], [0, 0, 1, 1], [], []>} : vector<8x8xbf16>, vector<8x32xbf16>, vector<8x32xf32> -> vector<8x32xf32>
      %50 = arith.addf %45, %49 : vector<8x32xf32>
      %c0_31 = arith.constant 0 : index
      %c0_32 = arith.constant 0 : index
      %51 = vector.load %arg11[%c0_31, %c0_32] : memref<8x32xf32, #tpu.memory_space<vmem>>, vector<8x32xf32>
      tpu.vector_store %arg11[%c0_31, %c0_32], %50 {strides = array<i32>} : memref<8x32xf32, #tpu.memory_space<vmem>>, vector<8x32xf32>,
    }
    %c4_i32_5 = arith.constant 4 : i32
    %c0_6 = arith.constant 0 : index
    %c0_7 = arith.constant 0 : index
    %11 = vector.load %arg11[%c0_6, %c0_7] : memref<8x32xf32, #tpu.memory_space<vmem>>, vector<8x32xf32>
    %c0_8 = arith.constant 0 : index
    %c0_9 = arith.constant 0 : index
    %12 = vector.load %arg7[%c0_8, %c0_9] : memref<1x32xf32, #tpu.memory_space<vmem>>, vector<1x32xf32>
    %13 = vector.broadcast %12 : vector<1x32xf32> to vector<8x32xf32>
    %14 = arith.addf %11, %13 : vector<8x32xf32>
    %c0_10 = arith.constant 0 : index
    %c0_11 = arith.constant 0 : index
    %c0_12 = arith.constant 0 : index
    %15 = vector.load %arg8[%c0_10, %c0_11, %c0_12] : memref<1x8x32xf32, #tpu.memory_space<vmem>>, vector<1x8x32xf32>
    %16 = vector.shape_cast %15 : vector<1x8x32xf32> to vector<8x32xf32>
    %17 = vector.shape_cast %14 : vector<8x32xf32> to vector<1x8x32xf32>
    tpu.vector_store %arg8[%c0_10, %c0_11, %c0_12], %17 {strides = array<i32>} : memref<1x8x32xf32, #tpu.memory_space<vmem>>, vector<1x8x32xf32>,
    return
  }
  func.func @transform_0(%arg0: i32, %arg1: i32) -> (i32, i32, i32) {
    %c0_i32 = arith.constant 0 : i32
    %c0_i32_0 = arith.constant 0 : i32
    %c0_i32_1 = arith.constant 0 : i32
    return %arg0, %c0_i32, %c0_i32_0 : i32, i32, i32
  }
  func.func @transform_1(%arg0: i32, %arg1: i32) -> (i32, i32, i32) {
    %c0_i32 = arith.constant 0 : i32
    %c0_i32_0 = arith.constant 0 : i32
    %c0_i32_1 = arith.constant 0 : i32
    %c0_i32_2 = arith.constant 0 : i32
    return %c0_i32, %c0_i32_0, %c0_i32_1 : i32, i32, i32
  }
  func.func @transform_2(%arg0: i32, %arg1: i32) -> (i32, i32, i32) {
    %c0_i32 = arith.constant 0 : i32
    %c0_i32_0 = arith.constant 0 : i32
    %c0_i32_1 = arith.constant 0 : i32
    %c0_i32_2 = arith.constant 0 : i32
    return %c0_i32, %c0_i32_0, %c0_i32_1 : i32, i32, i32
  }
  func.func @transform_3(%arg0: i32, %arg1: i32) -> (i32, i32, i32) {
    %c0_i32 = arith.constant 0 : i32
    %c0_i32_0 = arith.constant 0 : i32
    %c0_i32_1 = arith.constant 0 : i32
    %c0_i32_2 = arith.constant 0 : i32
    return %c0_i32, %c0_i32_0, %c0_i32_1 : i32, i32, i32
  }
  func.func @transform_4(%arg0: i32, %arg1: i32) -> (i32, i32, i32) {
    %c0_i32 = arith.constant 0 : i32
    %c0_i32_0 = arith.constant 0 : i32
    %c0_i32_1 = arith.constant 0 : i32
    %c0_i32_2 = arith.constant 0 : i32
    return %c0_i32, %c0_i32_0, %c0_i32_1 : i32, i32, i32
  }
  func.func @transform_5(%arg0: i32, %arg1: i32) -> (i32, i32) {
    %c0_i32 = arith.constant 0 : i32
    %c0_i32_0 = arith.constant 0 : i32
    %c0_i32_1 = arith.constant 0 : i32
    return %c0_i32, %c0_i32_0 : i32, i32
  }
  func.func @transform_6(%arg0: i32, %arg1: i32) -> (i32, i32, i32) {
    %c0_i32 = arith.constant 0 : i32
    %c0_i32_0 = arith.constant 0 : i32
    return %arg0, %arg1, %c0_i32 : i32, i32, i32
  }
}

</mosaic_0001>

<bundles_post_ra>
// kernel: tpu_custom_call.1
= control target key start
LH: loop header
LB: loop body
LE: loop exit
PB: predicated region body
PF: predicated region fallthrough
CT: control target
= control target key end

     0   :  { %11 = vsyncpa [#allocation6], 0  ;;  %s1016_s0 = inlined_call_operand.vmem [shape: bf16[2,8,32], index: 0, kind: input, shape index: {}]   ;;  %s1017_s1 = inlined_call_operand.vmem [shape: bf16[4,32,8], index: 1, kind: input, shape index: {}]   ;;  %s1018_s2 = inlined_call_operand.vmem [shape: bf16[4,8,32], index: 2, kind: input, shape index: {}]   ;;  %s1019_s3 = inlined_call_operand.vmem [shape: bf16[4,32,8], index: 3, kind: input, shape index: {}]   ;;  %s1020_s4 = inlined_call_operand.vmem [shape: bf16[4,8,32], index: 4, kind: input, shape index: {}]   ;;  %s1021_s5 = inlined_call_operand.vmem [shape: f32[1,32], index: 5, kind: input, shape index: {}]   ;;  %s1022_s6 = inlined_call_operand.hbm [shape: f32[2,8,32], index: 6, kind: output, shape index: {}]  }
   0x1   :  { %13 = vsyncpa [#allocation6 + $0x1], 0  ;;  %s849_s21 = smov 0   ;;  %s851_s22 = smov 0  }
   0x2   :  { %s853_s23 = smov 0   ;;  %s855_s24 = smov 0  }
   0x3   :  { %s857_s25 = smov 0   ;;  %s859_s26 = smov 0  }
   0x4 LB: > { %s591_s27 = sadd.s32 4294967295, %s803_s26   ;;  %s592_s28 = sadd.s32 4294967294, %s803_s26   ;;  %s803_s26 = sphi %s859_s26, %s19_s26   ;;  %s799_s25 = sphi %s857_s25, %s1029_s25   ;;  %s795_s24 = sphi %s855_s24, %s1028_s24   ;;  %s791_s23 = sphi %s853_s23, %s1027_s23   ;;  %s787_s22 = sphi %s851_s22, %s1026_s22   ;;  %s783_s21 = sphi %s849_s21, %s1025_s21  }
   0x5   : > { %s31_s29 = sadd.s32 1, %s799_s25  ;;  %s171_s30 = sadd.s32 1, %s791_s23 }
   0x6   : > { %p33_p0 = scmp.ge.s32.totalorder %s31_s29, 2  ;;  %p181_p1 = scmp.ne.s32.totalorder %s791_s23, %s787_s22 }
   0x7   : > { %p182_p2 = scmp.eq.s32.totalorder %s591_s27, 1  ;;  %p187_p3 = scmp.ne.s32.totalorder %s787_s22, %s783_s21 }
   0x8   : > { %s1031_s29 = smov (%p33_p0, %s31_s29), 0  ;;  %p188_p5 = scmp.eq.s32.totalorder %s592_s28, 1 }
   0x9   : > { %p889_p4 = por %p182_p2, %p181_p1  ;;  %s166_s8 = ssub.s32 %s799_s25, %s1031_s29 }
   0xa   : > { %p595_p6 = scmp.ge.s32.totalorder %s803_s26, 1  ;;  %p169_p7 = scmp.eq.s32.totalorder %s166_s8, 0 }
   0xb   : > { %p896_p8 = por %p188_p5, %p187_p3  ;;  %p228_p9 = scmp.lt.s32.totalorder %s803_s26, 3 }
   0xc   : > { %s902_s10 = scalar_select %p169_p7, %s791_s23, %s171_s30  }
   0xd   : > { %p229_p10 = pnand %p595_p6, %p228_p9 }
   0xe   : > { %s254_s11 = sand.u32 (!%p229_p10), 1, %s787_s22   ;;  %p257_p11 = scmp.lt.s32.totalorder (!%p229_p10), %s795_s24, 1 }
   0xf   : > { %232 = sbr.rel (%p229_p10) target bundleno = 969 (0x3c9), region = 44  ;;  %s908_s12 = sshll.u32 (!%p229_p10), %s254_s11, 3 }
  0x10   : > { %s256_s18 = scalar_lea.vmem (!%p229_p10), [#allocation5], %s908_s12  ;;  %s917_s19 = smov (!%p229_p10), 0  }
  0x14   : > { %s258_s13 = scalar_select %p257_p11, %s795_s24, 1 }
  0x16   : > { %s597_s14 = sshll.u32 %s258_s13, 2 }
  0x17   : > { %s914_s17 = scalar_lea.vmem %s1016_s0, %s597_s14 }
  0x18 LB: >> { %v272_v0 = vld [vmem:[%s914_s17] sm:$0xf]  ;;  %vm276_vm0 = vcmask 261120   ;;  %s634_s20 = sshll.u32 %s807_s19, 4  ;;  %s598_s27 = sshll.u32 %s807_s19, 2  ;;  %vm299_vm1 = vcmask 60416   ;;  %s807_s19 = sphi %s917_s19, %s271_s19  }
  0x19   : >> { %v281_v1 = vsel %vm276_vm0, %v272_v0, 0  ;;  %s303_s8 = scalar_lea.vmem %s1019_s3, %s634_s20  ;;  %s274_s15 = scalar_lea.vmem %s1018_s2, %s598_s27 }
  0x1a   : >> { %290 = vmatpush.bf16.xpose.msra.mxu0 %v281_v1  ;;  %v636_v2 = vld [vmem:[%s303_s8 + $0x8] sm:$0xff]  ;;  %v275_v3 = vld [vmem:[%s274_s15] sm:$0xf]  ;;  %s298_s16 = scalar_lea.vmem [#allocation2], %s598_s27  ;;  %s335_s20 = scalar_lea.vmem [#allocation3], %s598_s27 }
  0x1b   : >> { %326 = vmatpush.bf16.msra.mxu1 %v636_v2  ;;  %v635_v4 = vld [vmem:[%s303_s8] sm:$0xff]  ;;  %s271_s19 = sadd.s32 1, %s807_s19  }
  0x1c   : >> { %p268_p12 = scmp.ge.s32.totalorder %s271_s19, 4  }
  0x1d   : > { %v342_v11 = vld [vmem:[%s914_s17] sm:$0xf] (%p268_p12)  ;;  %v813_v12 = vmov (%p268_p12), 0.0   ;;  %s939_s28 = smov (%p268_p12), 0  }
  0x1e   : > { %344 = vst.msk [vmem:[#allocation4] sm:$0xff] (%p268_p12), %vm276_vm0, %v813_v12 }
  0x1f   : >> { %327 = vmatpush.bf16.msra.mxu1 %v635_v4 }
  0x21   : >> { %599 = vmatmul.msk.bf16.vlgmr.msra.gmra.mxu0 %vm276_vm0, %v275_v3 }
  0x22   : >> { %611 = vmatmul.msk.bf16.vlgmr.msra.gmra.mxu1 %vm276_vm0, %v272_v0 }
  0x9e   : >> { %v292_v5 = vpop.f32.mrf.mxu0 }
  0x9f   : >> { %v296_v6 = vpack.c.bf16 %v292_v5, %v292_v5  ;;  %v329_v7 = vpop.f32.mrf.mxu1 }
  0xa0   : >> { %v333_v8 = vpack.c.bf16 %v329_v7, %v329_v7 }
  0xa1   : >> { %300 = vst.msk [vmem:[%s298_s16] sm:$0xf] %vm299_vm1, %v296_v6 }
  0xa2   : >> { %336 = vst.msk [vmem:[%s335_s20] sm:$0xf] %vm299_vm1, %v333_v8 }
  0xa3   : > { %270 = sbr.rel (!%p268_p12) target bundleno = 24 (0x18), region = 106 }
  0xa6   : >> { %v294_v9 = vpop.f32.mrf.mxu0 }
  0xa7   : >> { %v331_v10 = vpop.f32.mrf.mxu1 }
  0xa8 LB: >> { %s637_s27 = sshll.u32 %s811_s28, 4  ;;  %s950_s17 = sshll.u32 %s811_s28, 2  ;;  %vm394_vm2 = vcmask 1043456   ;;  %vm390_vm3 = vcmask 64512   ;;  %v446_v39 = vld [vmem:[#allocation4] sm:$0xff]  ;;  %s811_s28 = sphi %s939_s28, %s350_s28  }
  0xa9   : >> { %s353_s19 = scalar_lea.vmem %s1017_s1, %s637_s27  ;;  %s388_s13 = scalar_lea.vmem [#allocation2], %s950_s17 }
  0xaa   : >> { %v639_v13 = vld [vmem:[%s353_s19 + $0x8] sm:$0xff]  ;;  %v638_v14 = vld [vmem:[%s353_s19] sm:$0xff]  ;;  %s424_s14 = scalar_lea.vmem [#allocation3], %s950_s17  ;;  %s448_s20 = scalar_lea.vmem %s1020_s4, %s950_s17 }
  0xab   : >> { %379 = vmatpush.bf16.msra.mxu0 %v639_v13  ;;  %v389_v15 = vld [vmem:[%s388_s13] sm:$0xf]  ;;  %s350_s28 = sadd.s32 1, %s811_s28  }
  0xac   : >> { %v396_v16 = vsel %vm394_vm2, %v389_v15, 0  ;;  %v425_v28 = vld [vmem:[%s424_s14] sm:$0xf]  ;;  %p347_p13 = scmp.ge.s32.totalorder %s350_s28, 4  }
  0xad   : >> { %405 = vmatpush.bf16.msra.mxu1 %v396_v16  ;;  %v430_v29 = vsel %vm394_vm2, %v425_v28, 0  ;;  %v449_v34 = vld [vmem:[%s448_s20] sm:$0xf]  ;;  %s631_s8 = sshll.u32 (%p347_p13), %s795_s24, 3  ;;  %s492_s19 = sshll.u32 (%p347_p13), %s256_s18, 4  ;;  %s493_s19 = int_to_ptr.vmem [resolvable:$true] %s492_s19 }
  0xae   : >> { %439 = vmatpush.bf16.msra.mxu2 %v430_v29  ;;  %v454_v35 = vsel %vm394_vm2, %v449_v34, 0  ;;  %v716_v44 = vld [vmem:[%s1021_s5] ss:$0 sm:$0xff] (%p347_p13)  ;;  %s490_s14 = scalar_lea.hbm (%p347_p13), %s1022_s6, %s631_s8  ;;  %s479_s15 = scalar_lea.sflag (%p347_p13), [#allocation6], %s254_s11 }
  0xaf   : >> { %380 = vmatpush.bf16.msra.mxu0 %v638_v14  ;;  %463 = vmatpush.bf16.msra.mxu3 %v454_v35  ;;  %s494_s28 = sshll.u32 (%p347_p13), %s490_s14, 4  ;;  %s737_s30 = scalar_lea.hbm (%p347_p13), %s1022_s6, 16  ;;  %s495_s28 = int_to_ptr.hbm [resolvable:$true] %s494_s28 }
  0xb0   : > { %s731_s16 = sshra.s32 (%p347_p13), %s495_s28, 4  ;;  %s732_s16 = int_to_ptr.hbm [resolvable:$true] %s731_s16 }
  0xb1   : > { %s733_s20 = scalar_lea.hbm (%p347_p13), %s732_s16, 8  ;;  %p738_p3 = scmp.lt.s32.totalorder (%p347_p13), %s732_s16, %s1022_s6 }
  0xb2   : >> { %623 = vmatmul.msk.bf16.vlgmr.msra.gmra.mxu0 %vm276_vm0, %v342_v11  ;;  %p734_p0 = scmp.ne.s32.totalorder (%p347_p13), %s732_s16, %s733_s20  ;;  %p739_p5 = scmp.lt.s32.totalorder (%p347_p13), %s737_s30, %s733_s20 }
  0xb4   : > { %p735_p1 = pnand (%p347_p13), %p734_p0, %p889_p4  ;;  %p740_p6 = por (%p347_p13), %p739_p5, %p738_p3 }
  0xb6   : > { %p736_p2 = pneg (%p347_p13), %p735_p1 }
  0xb8   : > { %p741_p7 = pnand (%p347_p13), %p740_p6, %p736_p2 }
 0x12f   : >> { %v382_v17 = vpop.f32.mrf.mxu0 }
 0x130   : >> { %v386_v18 = vpack.c.bf16 %v382_v17, %v382_v17 }
 0x132   : >> { %625 = vmatmul.msk.bf16.vlgmr.msra.gmra.mxu1 %vm390_vm3, %v386_v18 }
 0x137   : >> { %v384_v19 = vpop.f32.mrf.mxu0 }
 0x1af   : >> { %v407_v20 = vpop.f32.mrf.mxu1 }
 0x1b0   : >> { %v411_v21 = vsel %vm390_vm3, %v407_v20, -inf }
 0x1b1   : >> { %412 = vmax.xlane.f32.xlu0 %v411_v21 }
 0x1b7   : >> { %v409_v22 = vpop.f32.mrf.mxu1 }
 0x224   : >> { %v413_v23 = vpop.xlane.xlu0 %412 }
 0x225   : >> { %v414_v24 = vsub.f32 %v407_v20, %v413_v23 }
 0x227   : >> { %v415_v25 = vmul.f32 1.442695, %v414_v24 }
 0x229   : >> { %712 = vpow2.f32 %v415_v25 }
 0x22f   : >> { %v713_v26 = vpop.eup %712 }
 0x230   : >> { %v417_v27 = vsel %vm390_vm3, %v713_v26, 0.0 }
 0x231   : >> { %418 = vadd.xlane.f32.xlu0 %v417_v27 }
 0x2a4   : >> { %v419_v30 = vpop.xlane.xlu0 %418 }
 0x2a5   : >> { %714 = vrcp.f32 %v419_v30 }
 0x2ab   : >> { %v715_v31 = vpop.eup %714 }
 0x2ac   : >> { %v421_v32 = vmul.f32 %v715_v31, %v713_v26 }
 0x2ae   : >> { %v422_v33 = vpack.c.bf16 %v421_v32, %v421_v32 }
 0x2b0   : >> { %627 = vmatmul.msk.bf16.vlgmr.msra.gmra.mxu2 %vm390_vm3, %v422_v33 }
 0x333   : >> { %v441_v36 = vpop.f32.mrf.mxu2 }
 0x334   : >> { %v445_v37 = vpack.c.bf16 %v441_v36, %v441_v36 }
 0x336   : >> { %629 = vmatmul.msk.bf16.vlgmr.msra.gmra.mxu3 %vm390_vm3, %v445_v37 }
 0x33b   : >> { %v443_v38 = vpop.f32.mrf.mxu2 }
 0x3b9   : >> { %v465_v40 = vpop.f32.mrf.mxu3 }
 0x3ba   : >> { %v469_v41 = vadd.f32 %v465_v40, %v446_v39 }
 0x3bc   : >> { %470 = vst.msk [vmem:[#allocation4] sm:$0xff] %vm276_vm0, %v469_v41 }
 0x3c1   : >> { %v467_v42 = vpop.f32.mrf.mxu3  ;;  %349 = sbr.rel (!%p347_p13) target bundleno = 168 (0xa8), region = 117 }
 0x3c3   : > { %v471_v43 = vld [vmem:[#allocation4] sm:$0xff] (%p347_p13) }
 0x3c4   : > { %v476_v45 = vadd.f32 (%p347_p13), %v716_v44, %v471_v43 }
 0x3c6   : > { %477 = vst.msk [vmem:[%s256_s18] sm:$0xff] %vm276_vm0, %v476_v45 }
 0x3c7   : > { %744 = shalt.err (!%p741_p7)
}
 0x3c8   : > { %640 = dma.vmem_to_hbm [thread:$0]  (%p889_p4), %s493_s19, 128, %s495_s28, %s479_s15  }
 0x3c9 PF: > { %p646_p9 = scmp.ge.s32.totalorder %s803_s26, 2  ;;  %s506_s11 = sand.u32 1, %s783_s21  }
 0x3ca   : > { %s507_s12 = scalar_lea.sflag [#allocation6], %s506_s11 }
 0x3cb   : > { %p643_p10 = pnand %p646_p9, %p896_p8 }
 0x3cd   : > { %p644_p11 = pneg %p643_p10 }
 0x3cf   : > { %778 = dma.done.wait (%p644_p11), %s507_s12, 128  }
 0x3d0   : > { %780 = vsyncadd (%p644_p11), %s507_s12, 4294967168  ;;  %s19_s26 = sadd.s32 1, %s803_s26   ;;  %s1025_s21 = smov %s787_s22 }
 0x3d1   : > { %p16_p12 = scmp.ge.s32.totalorder %s19_s26, 4   ;;  %s1026_s22 = smov %s791_s23 }
 0x3d2   : > { %s1027_s23 = smov %s902_s10  ;;  %s1028_s24 = smov %s799_s25 }
 0x3d3   : > { %s1029_s25 = smov %s1031_s29  ;;  %18 = sbr.rel (!%p16_p12) target bundleno = 4 (0x4), region = 128 }
 0x3d8   :  { %513 = vsyncpa [#allocation6], 1 }
 0x3d9   :  { %515 = vsyncpa [#allocation6 + $0x1], 1 }

</bundles_post_ra>
